<compile_context>
chip_gen: v6e
topology: v6e:2x2x1
jax: 0.10.0
libtpu: 0.0.40
codegen_flags: <defaults>
</compile_context>

<pallas_src>
import functools

import jax
import jax.numpy as jnp
from jax.experimental import pallas as pl
from jax.experimental.pallas import tpu as pltpu

# ----------------------------- model config ---------------------------------
BATCH = 8
STATE_DIM = 32
HIDDEN_DIM = 64
RESNET_DIM = 32
NUM_BLOCKS = 2
POLICY_OUT = 12
VALUE_OUT = 1
HEAD_OUT = POLICY_OUT + VALUE_OUT
BATCH_NORM = True
BN_EPS = 1e-5

PAD = 128                            # lane-dense padded feature width
NUM_MATS = 2 + 2 * NUM_BLOCKS + 1    # stem fc_a/fc_b + per-block fc_a/fc_b + fused head


# ------------------------------ Pallas kernel -------------------------------
def resnet_kernel(x_ref, w_ref, b_ref, out_ref, *, num_blocks, batch_norm, eps):
    # w_ref: (NUM_MATS, PAD, PAD) zero-padded weights, layout y = x @ W + b
    # b_ref: (NUM_MATS, 1, PAD)   zero-padded biases
    def linear(h, idx):
        return jnp.dot(h, w_ref[idx], preferred_element_type=jnp.float32) + b_ref[idx]

    def bn(y):
        # BatchNorm1d training-mode stats (gamma=1, beta=0), single-pass:
        # var = E[y^2] - mean^2 (clamped), rsqrt on the EUP.
        mean = jnp.mean(y, axis=0, keepdims=True)
        mean_sq = jnp.mean(y * y, axis=0, keepdims=True)
        var = jnp.maximum(mean_sq - mean * mean, 0.0)
        return (y - mean) * jax.lax.rsqrt(var + eps)

    def bn_relu(y):
        if batch_norm:
            y = bn(y)
        return jnp.maximum(y, 0.0)

    # ----- backbone stem: fc_a -> bn -> relu -> fc_b -> bn -> relu ----------
    h = bn_relu(linear(x_ref[...], 0))
    h = bn_relu(linear(h, 1))

    # ----- resnet blocks (statically unrolled) -------------------------------
    skip_outer = h
    for i in range(num_blocks):
        blk_skip = h
        z = bn_relu(linear(h, 2 + 2 * i))
        z = linear(z, 3 + 2 * i)
        if batch_norm:
            z = bn(z)
        z = z + blk_skip                        # residual inside ResnetBlock
        if i == 0:
            h = jnp.maximum(z, 0.0)
        else:
            h = jnp.maximum(z + skip_outer, 0.0)  # outer skip from before blocks

    if batch_norm:
        h = bn(h)
    h = jnp.maximum(h, 0.0)

    # ----- fused policy + value head (one matmul, one lane-dense store) ------
    out_ref[...] = linear(h, 2 + 2 * num_blocks)


# ------------------------------ wrapper --------------------------------------
def resnet_forward(x, packed_params):
    w_slab, b_slab = packed_params
    x_pad = jnp.pad(x, ((0, 0), (0, PAD - x.shape[1])))

    kernel = functools.partial(
        resnet_kernel, num_blocks=NUM_BLOCKS, batch_norm=BATCH_NORM, eps=BN_EPS)

    matmul_flops = 2 * x.shape[0] * (
        STATE_DIM * HIDDEN_DIM
        + HIDDEN_DIM * RESNET_DIM
        + NUM_BLOCKS * 2 * RESNET_DIM * RESNET_DIM
        + RESNET_DIM * HEAD_OUT)
    # one rsqrt per feature per BN call
    transcendentals = HIDDEN_DIM + (2 + 2 * NUM_BLOCKS) * RESNET_DIM
    bytes_accessed = 4 * (x_pad.size + w_slab.size + b_slab.size
                          + x.shape[0] * PAD)
    cost = pl.CostEstimate(flops=matmul_flops,
                           transcendentals=transcendentals,
                           bytes_accessed=bytes_accessed)

    vmem = pl.BlockSpec(memory_space=pltpu.MemorySpace.VMEM)
    out = pl.pallas_call(
        kernel,
        out_shape=jax.ShapeDtypeStruct((x.shape[0], PAD), jnp.float32),
        in_specs=[vmem, vmem, vmem],
        out_specs=vmem,
        cost_estimate=cost,
    )(x_pad, w_slab, b_slab)

    logits = out[:, :POLICY_OUT]
    value = out[:, POLICY_OUT:HEAD_OUT]
    return logits, value


# --------------------------- parameter packing --------------------------------
def _pad2(a, rows, cols):
    r, c = a.shape
    return jnp.pad(a, ((0, rows - r), (0, cols - c)))


def pack_params(params):
    """Pack the 13 parameter tensors into (NUM_MATS,PAD,PAD) and (NUM_MATS,1,PAD)."""
    (w_a, b_a, w_b, b_b, blk_wa, blk_ba, blk_wb, blk_bb,
     w_l, b_l, w_v, b_v) = params
    ws = [_pad2(w_a, PAD, PAD), _pad2(w_b, PAD, PAD)]
    bs = [_pad2(b_a, 1, PAD), _pad2(b_b, 1, PAD)]
    for i in range(NUM_BLOCKS):
        ws += [_pad2(blk_wa[i], PAD, PAD), _pad2(blk_wb[i], PAD, PAD)]
        bs += [_pad2(blk_ba[i], 1, PAD), _pad2(blk_bb[i], 1, PAD)]
    w_head = jnp.concatenate([w_l, w_v], axis=1)   # (R, POLICY_OUT + VALUE_OUT)
    b_head = jnp.concatenate([b_l, b_v], axis=1)   # (1, POLICY_OUT + VALUE_OUT)
    ws.append(_pad2(w_head, PAD, PAD))
    bs.append(_pad2(b_head, 1, PAD))
    w_slab = jnp.stack(ws)                         # (NUM_MATS, PAD, PAD)
    b_slab = jnp.stack(bs)                         # (NUM_MATS, 1, PAD)
    return w_slab, b_slab


# --------------------------- deterministic params ----------------------------
def _linear_init(key, fan_in, fan_out):
    # PyTorch nn.Linear default: U(-1/sqrt(fan_in), 1/sqrt(fan_in))
    kw, kb = jax.random.split(key)
    bound = 1.0 / jnp.sqrt(jnp.float32(fan_in))
    w = jax.random.uniform(kw, (fan_in, fan_out), jnp.float32, -bound, bound)
    b = jax.random.uniform(kb, (1, fan_out), jnp.float32, -bound, bound)
    return w, b


def make_params(key):
    keys = jax.random.split(key, 4 + 2 * NUM_BLOCKS)
    w_a, b_a = _linear_init(keys[0], STATE_DIM, HIDDEN_DIM)
    w_b, b_b = _linear_init(keys[1], HIDDEN_DIM, RESNET_DIM)
    blk_wa, blk_ba, blk_wb, blk_bb = [], [], [], []
    for i in range(NUM_BLOCKS):
        wa, ba = _linear_init(keys[2 + 2 * i], RESNET_DIM, RESNET_DIM)
        wb, bb = _linear_init(keys[3 + 2 * i], RESNET_DIM, RESNET_DIM)
        blk_wa.append(wa); blk_ba.append(ba)
        blk_wb.append(wb); blk_bb.append(bb)
    blk_wa = jnp.stack(blk_wa); blk_ba = jnp.stack(blk_ba)
    blk_wb = jnp.stack(blk_wb); blk_bb = jnp.stack(blk_bb)
    w_l, b_l = _linear_init(keys[2 + 2 * NUM_BLOCKS], RESNET_DIM, POLICY_OUT)
    w_v, b_v = _linear_init(keys[3 + 2 * NUM_BLOCKS], RESNET_DIM, VALUE_OUT)
    return (w_a, b_a, w_b, b_b, blk_wa, blk_ba, blk_wb, blk_bb,
            w_l, b_l, w_v, b_v)


# ------------------------------ pure-JAX reference ---------------------------
def reference_forward(x, params):
    (w_a, b_a, w_b, b_b, blk_wa, blk_ba, blk_wb, blk_bb,
     w_l, b_l, w_v, b_v) = params

    def bn(y):
        mean = jnp.mean(y, axis=0, keepdims=True)
        var = jnp.mean(jnp.square(y - mean), axis=0, keepdims=True)
        return (y - mean) / jnp.sqrt(var + BN_EPS)

    relu = lambda y: jnp.maximum(y, 0.0)

    h = x @ w_a + b_a
    if BATCH_NORM:
        h = bn(h)
    h = relu(h)
    h = h @ w_b + b_b
    if BATCH_NORM:
        h = bn(h)
    h = relu(h)
    skip_outer = h
    for i in range(NUM_BLOCKS):
        blk_skip = h
        z = h @ blk_wa[i] + blk_ba[i]
        if BATCH_NORM:
            z = bn(z)
        z = relu(z)
        z = z @ blk_wb[i] + blk_bb[i]
        if BATCH_NORM:
            z = bn(z)
        z = z + blk_skip
        h = relu(z) if i == 0 else relu(z + skip_outer)
    if BATCH_NORM:
        h = bn(h)
    h = relu(h)
    return h @ w_l + b_l, h @ w_v + b_v


# ----------------------------------- main ------------------------------------
if __name__ == "__main__":
    key = jax.random.PRNGKey(0)
    kx, kp = jax.random.split(key)
    x = jax.random.normal(kx, (BATCH, STATE_DIM), jnp.float32)
    params = make_params(kp)
    packed = pack_params(params)   # one-time packing outside the hot path

    logits, value = resnet_forward(x, packed)
    logits = jax.block_until_ready(logits)
    value = jax.block_until_ready(value)

    ref_logits, ref_value = reference_forward(x, params)
    assert logits.shape == (BATCH, POLICY_OUT) and value.shape == (BATCH, VALUE_OUT)
    assert jnp.allclose(logits, ref_logits, atol=1e-4, rtol=1e-4)
    assert jnp.allclose(value, ref_value, atol=1e-4, rtol=1e-4)

    print("KERNEL_OK")
</pallas_src>

<mosaic_0001>
module attributes {stable_mosaic.version = 11 : i64} {
  func.func @resnet_kernel(%arg0: memref<8x128xf32, #tpu.memory_space<vmem>>, %arg1: memref<7x128x128xf32, #tpu.memory_space<vmem>>, %arg2: memref<7x1x128xf32, #tpu.memory_space<vmem>>, %arg3: memref<8x128xf32, #tpu.memory_space<vmem>>) attributes {dimension_semantics = [], scalar_prefetch = 0 : i64, scratch_operands = 0 : i64, tpu.core_type = #tpu.core_type<tc>} {
    %c0 = arith.constant 0 : index
    %c0_0 = arith.constant 0 : index
    %0 = vector.load %arg0[%c0, %c0_0] : memref<8x128xf32, #tpu.memory_space<vmem>>, vector<8x128xf32>
    %c0_1 = arith.constant 0 : index
    %c0_2 = arith.constant 0 : index
    %c0_3 = arith.constant 0 : index
    %1 = vector.load %arg1[%c0_1, %c0_2, %c0_3] : memref<7x128x128xf32, #tpu.memory_space<vmem>>, vector<1x128x128xf32>
    %2 = vector.shape_cast %1 : vector<1x128x128xf32> to vector<128x128xf32>
    %cst = arith.constant dense<0.000000e+00> : vector<8x128xf32>
    %3 = tpu.matmul %0, %2, %cst {dimension_numbers = #tpu.dot_dimension_numbers<[1], [0], [0], [1], [0, 0, 1, 1], [], []>} : vector<8x128xf32>, vector<128x128xf32>, vector<8x128xf32> -> vector<8x128xf32>
    %c0_4 = arith.constant 0 : index
    %c0_5 = arith.constant 0 : index
    %c0_6 = arith.constant 0 : index
    %4 = vector.load %arg2[%c0_4, %c0_5, %c0_6] : memref<7x1x128xf32, #tpu.memory_space<vmem>>, vector<1x1x128xf32>
    %5 = vector.shape_cast %4 : vector<1x1x128xf32> to vector<1x128xf32>
    %6 = vector.broadcast %5 : vector<1x128xf32> to vector<8x128xf32>
    %7 = arith.addf %3, %6 : vector<8x128xf32>
    %cst_7 = arith.constant dense<0.000000e+00> : vector<128xf32>
    %8 = vector.multi_reduction <add>, %7, %cst_7 [0] : vector<8x128xf32> to vector<128xf32>
    %9 = vector.shape_cast %8 : vector<128xf32> to vector<1x128xf32>
    %cst_8 = arith.constant 8.000000e+00 : f32
    %10 = vector.broadcast %cst_8 : f32 to vector<1x128xf32>
    %11 = arith.divf %9, %10 : vector<1x128xf32>
    %12 = arith.mulf %7, %7 : vector<8x128xf32>
    %cst_9 = arith.constant dense<0.000000e+00> : vector<128xf32>
    %13 = vector.multi_reduction <add>, %12, %cst_9 [0] : vector<8x128xf32> to vector<128xf32>
    %14 = vector.shape_cast %13 : vector<128xf32> to vector<1x128xf32>
    %cst_10 = arith.constant 8.000000e+00 : f32
    %15 = vector.broadcast %cst_10 : f32 to vector<1x128xf32>
    %16 = arith.divf %14, %15 : vector<1x128xf32>
    %17 = arith.mulf %11, %11 : vector<1x128xf32>
    %18 = arith.subf %16, %17 : vector<1x128xf32>
    %cst_11 = arith.constant 0.000000e+00 : f32
    %19 = vector.broadcast %cst_11 : f32 to vector<1x128xf32>
    %20 = arith.maximumf %18, %19 : vector<1x128xf32>
    %21 = vector.broadcast %11 : vector<1x128xf32> to vector<8x128xf32>
    %22 = arith.subf %7, %21 : vector<8x128xf32>
    %cst_12 = arith.constant 9.99999974E-6 : f32
    %23 = vector.broadcast %cst_12 : f32 to vector<1x128xf32>
    %24 = arith.addf %20, %23 : vector<1x128xf32>
    %25 = math.rsqrt %24 : vector<1x128xf32>
    %26 = vector.broadcast %25 : vector<1x128xf32> to vector<8x128xf32>
    %27 = arith.mulf %22, %26 : vector<8x128xf32>
    %cst_13 = arith.constant 0.000000e+00 : f32
    %28 = vector.broadcast %cst_13 : f32 to vector<8x128xf32>
    %29 = arith.maximumf %27, %28 : vector<8x128xf32>
    %c1 = arith.constant 1 : index
    %c0_14 = arith.constant 0 : index
    %c0_15 = arith.constant 0 : index
    %30 = vector.load %arg1[%c1, %c0_14, %c0_15] : memref<7x128x128xf32, #tpu.memory_space<vmem>>, vector<1x128x128xf32>
    %31 = vector.shape_cast %30 : vector<1x128x128xf32> to vector<128x128xf32>
    %cst_16 = arith.constant dense<0.000000e+00> : vector<8x128xf32>
    %32 = tpu.matmul %29, %31, %cst_16 {dimension_numbers = #tpu.dot_dimension_numbers<[1], [0], [0], [1], [0, 0, 1, 1], [], []>} : vector<8x128xf32>, vector<128x128xf32>, vector<8x128xf32> -> vector<8x128xf32>
    %c1_17 = arith.constant 1 : index
    %c0_18 = arith.constant 0 : index
    %c0_19 = arith.constant 0 : index
    %33 = vector.load %arg2[%c1_17, %c0_18, %c0_19] : memref<7x1x128xf32, #tpu.memory_space<vmem>>, vector<1x1x128xf32>
    %34 = vector.shape_cast %33 : vector<1x1x128xf32> to vector<1x128xf32>
    %35 = vector.broadcast %34 : vector<1x128xf32> to vector<8x128xf32>
    %36 = arith.addf %32, %35 : vector<8x128xf32>
    %cst_20 = arith.constant dense<0.000000e+00> : vector<128xf32>
    %37 = vector.multi_reduction <add>, %36, %cst_20 [0] : vector<8x128xf32> to vector<128xf32>
    %38 = vector.shape_cast %37 : vector<128xf32> to vector<1x128xf32>
    %cst_21 = arith.constant 8.000000e+00 : f32
    %39 = vector.broadcast %cst_21 : f32 to vector<1x128xf32>
    %40 = arith.divf %38, %39 : vector<1x128xf32>
    %41 = arith.mulf %36, %36 : vector<8x128xf32>
    %cst_22 = arith.constant dense<0.000000e+00> : vector<128xf32>
    %42 = vector.multi_reduction <add>, %41, %cst_22 [0] : vector<8x128xf32> to vector<128xf32>
    %43 = vector.shape_cast %42 : vector<128xf32> to vector<1x128xf32>
    %cst_23 = arith.constant 8.000000e+00 : f32
    %44 = vector.broadcast %cst_23 : f32 to vector<1x128xf32>
    %45 = arith.divf %43, %44 : vector<1x128xf32>
    %46 = arith.mulf %40, %40 : vector<1x128xf32>
    %47 = arith.subf %45, %46 : vector<1x128xf32>
    %cst_24 = arith.constant 0.000000e+00 : f32
    %48 = vector.broadcast %cst_24 : f32 to vector<1x128xf32>
    %49 = arith.maximumf %47, %48 : vector<1x128xf32>
    %50 = vector.broadcast %40 : vector<1x128xf32> to vector<8x128xf32>
    %51 = arith.subf %36, %50 : vector<8x128xf32>
    %cst_25 = arith.constant 9.99999974E-6 : f32
    %52 = vector.broadcast %cst_25 : f32 to vector<1x128xf32>
    %53 = arith.addf %49, %52 : vector<1x128xf32>
    %54 = math.rsqrt %53 : vector<1x128xf32>
    %55 = vector.broadcast %54 : vector<1x128xf32> to vector<8x128xf32>
    %56 = arith.mulf %51, %55 : vector<8x128xf32>
    %cst_26 = arith.constant 0.000000e+00 : f32
    %57 = vector.broadcast %cst_26 : f32 to vector<8x128xf32>
    %58 = arith.maximumf %56, %57 : vector<8x128xf32>
    %c2 = arith.constant 2 : index
    %c0_27 = arith.constant 0 : index
    %c0_28 = arith.constant 0 : index
    %59 = vector.load %arg1[%c2, %c0_27, %c0_28] : memref<7x128x128xf32, #tpu.memory_space<vmem>>, vector<1x128x128xf32>
    %60 = vector.shape_cast %59 : vector<1x128x128xf32> to vector<128x128xf32>
    %cst_29 = arith.constant dense<0.000000e+00> : vector<8x128xf32>
    %61 = tpu.matmul %58, %60, %cst_29 {dimension_numbers = #tpu.dot_dimension_numbers<[1], [0], [0], [1], [0, 0, 1, 1], [], []>} : vector<8x128xf32>, vector<128x128xf32>, vector<8x128xf32> -> vector<8x128xf32>
    %c2_30 = arith.constant 2 : index
    %c0_31 = arith.constant 0 : index
    %c0_32 = arith.constant 0 : index
    %62 = vector.load %arg2[%c2_30, %c0_31, %c0_32] : memref<7x1x128xf32, #tpu.memory_space<vmem>>, vector<1x1x128xf32>
    %63 = vector.shape_cast %62 : vector<1x1x128xf32> to vector<1x128xf32>
    %64 = vector.broadcast %63 : vector<1x128xf32> to vector<8x128xf32>
    %65 = arith.addf %61, %64 : vector<8x128xf32>
    %cst_33 = arith.constant dense<0.000000e+00> : vector<128xf32>
    %66 = vector.multi_reduction <add>, %65, %cst_33 [0] : vector<8x128xf32> to vector<128xf32>
    %67 = vector.shape_cast %66 : vector<128xf32> to vector<1x128xf32>
    %cst_34 = arith.constant 8.000000e+00 : f32
    %68 = vector.broadcast %cst_34 : f32 to vector<1x128xf32>
    %69 = arith.divf %67, %68 : vector<1x128xf32>
    %70 = arith.mulf %65, %65 : vector<8x128xf32>
    %cst_35 = arith.constant dense<0.000000e+00> : vector<128xf32>
    %71 = vector.multi_reduction <add>, %70, %cst_35 [0] : vector<8x128xf32> to vector<128xf32>
    %72 = vector.shape_cast %71 : vector<128xf32> to vector<1x128xf32>
    %cst_36 = arith.constant 8.000000e+00 : f32
    %73 = vector.broadcast %cst_36 : f32 to vector<1x128xf32>
    %74 = arith.divf %72, %73 : vector<1x128xf32>
    %75 = arith.mulf %69, %69 : vector<1x128xf32>
    %76 = arith.subf %74, %75 : vector<1x128xf32>
    %cst_37 = arith.constant 0.000000e+00 : f32
    %77 = vector.broadcast %cst_37 : f32 to vector<1x128xf32>
    %78 = arith.maximumf %76, %77 : vector<1x128xf32>
    %79 = vector.broadcast %69 : vector<1x128xf32> to vector<8x128xf32>
    %80 = arith.subf %65, %79 : vector<8x128xf32>
    %cst_38 = arith.constant 9.99999974E-6 : f32
    %81 = vector.broadcast %cst_38 : f32 to vector<1x128xf32>
    %82 = arith.addf %78, %81 : vector<1x128xf32>
    %83 = math.rsqrt %82 : vector<1x128xf32>
    %84 = vector.broadcast %83 : vector<1x128xf32> to vector<8x128xf32>
    %85 = arith.mulf %80, %84 : vector<8x128xf32>
    %cst_39 = arith.constant 0.000000e+00 : f32
    %86 = vector.broadcast %cst_39 : f32 to vector<8x128xf32>
    %87 = arith.maximumf %85, %86 : vector<8x128xf32>
    %c3 = arith.constant 3 : index
    %c0_40 = arith.constant 0 : index
    %c0_41 = arith.constant 0 : index
    %88 = vector.load %arg1[%c3, %c0_40, %c0_41] : memref<7x128x128xf32, #tpu.memory_space<vmem>>, vector<1x128x128xf32>
    %89 = vector.shape_cast %88 : vector<1x128x128xf32> to vector<128x128xf32>
    %cst_42 = arith.constant dense<0.000000e+00> : vector<8x128xf32>
    %90 = tpu.matmul %87, %89, %cst_42 {dimension_numbers = #tpu.dot_dimension_numbers<[1], [0], [0], [1], [0, 0, 1, 1], [], []>} : vector<8x128xf32>, vector<128x128xf32>, vector<8x128xf32> -> vector<8x128xf32>
    %c3_43 = arith.constant 3 : index
    %c0_44 = arith.constant 0 : index
    %c0_45 = arith.constant 0 : index
    %91 = vector.load %arg2[%c3_43, %c0_44, %c0_45] : memref<7x1x128xf32, #tpu.memory_space<vmem>>, vector<1x1x128xf32>
    %92 = vector.shape_cast %91 : vector<1x1x128xf32> to vector<1x128xf32>
    %93 = vector.broadcast %92 : vector<1x128xf32> to vector<8x128xf32>
    %94 = arith.addf %90, %93 : vector<8x128xf32>
    %cst_46 = arith.constant dense<0.000000e+00> : vector<128xf32>
    %95 = vector.multi_reduction <add>, %94, %cst_46 [0] : vector<8x128xf32> to vector<128xf32>
    %96 = vector.shape_cast %95 : vector<128xf32> to vector<1x128xf32>
    %cst_47 = arith.constant 8.000000e+00 : f32
    %97 = vector.broadcast %cst_47 : f32 to vector<1x128xf32>
    %98 = arith.divf %96, %97 : vector<1x128xf32>
    %99 = arith.mulf %94, %94 : vector<8x128xf32>
    %cst_48 = arith.constant dense<0.000000e+00> : vector<128xf32>
    %100 = vector.multi_reduction <add>, %99, %cst_48 [0] : vector<8x128xf32> to vector<128xf32>
    %101 = vector.shape_cast %100 : vector<128xf32> to vector<1x128xf32>
    %cst_49 = arith.constant 8.000000e+00 : f32
    %102 = vector.broadcast %cst_49 : f32 to vector<1x128xf32>
    %103 = arith.divf %101, %102 : vector<1x128xf32>
    %104 = arith.mulf %98, %98 : vector<1x128xf32>
    %105 = arith.subf %103, %104 : vector<1x128xf32>
    %cst_50 = arith.constant 0.000000e+00 : f32
    %106 = vector.broadcast %cst_50 : f32 to vector<1x128xf32>
    %107 = arith.maximumf %105, %106 : vector<1x128xf32>
    %108 = vector.broadcast %98 : vector<1x128xf32> to vector<8x128xf32>
    %109 = arith.subf %94, %108 : vector<8x128xf32>
    %cst_51 = arith.constant 9.99999974E-6 : f32
    %110 = vector.broadcast %cst_51 : f32 to vector<1x128xf32>
    %111 = arith.addf %107, %110 : vector<1x128xf32>
    %112 = math.rsqrt %111 : vector<1x128xf32>
    %113 = vector.broadcast %112 : vector<1x128xf32> to vector<8x128xf32>
    %114 = arith.mulf %109, %113 : vector<8x128xf32>
    %115 = arith.addf %114, %58 : vector<8x128xf32>
    %cst_52 = arith.constant 0.000000e+00 : f32
    %116 = vector.broadcast %cst_52 : f32 to vector<8x128xf32>
    %117 = arith.maximumf %115, %116 : vector<8x128xf32>
    %c4 = arith.constant 4 : index
    %c0_53 = arith.constant 0 : index
    %c0_54 = arith.constant 0 : index
    %118 = vector.load %arg1[%c4, %c0_53, %c0_54] : memref<7x128x128xf32, #tpu.memory_space<vmem>>, vector<1x128x128xf32>
    %119 = vector.shape_cast %118 : vector<1x128x128xf32> to vector<128x128xf32>
    %cst_55 = arith.constant dense<0.000000e+00> : vector<8x128xf32>
    %120 = tpu.matmul %117, %119, %cst_55 {dimension_numbers = #tpu.dot_dimension_numbers<[1], [0], [0], [1], [0, 0, 1, 1], [], []>} : vector<8x128xf32>, vector<128x128xf32>, vector<8x128xf32> -> vector<8x128xf32>
    %c4_56 = arith.constant 4 : index
    %c0_57 = arith.constant 0 : index
    %c0_58 = arith.constant 0 : index
    %121 = vector.load %arg2[%c4_56, %c0_57, %c0_58] : memref<7x1x128xf32, #tpu.memory_space<vmem>>, vector<1x1x128xf32>
    %122 = vector.shape_cast %121 : vector<1x1x128xf32> to vector<1x128xf32>
    %123 = vector.broadcast %122 : vector<1x128xf32> to vector<8x128xf32>
    %124 = arith.addf %120, %123 : vector<8x128xf32>
    %cst_59 = arith.constant dense<0.000000e+00> : vector<128xf32>
    %125 = vector.multi_reduction <add>, %124, %cst_59 [0] : vector<8x128xf32> to vector<128xf32>
    %126 = vector.shape_cast %125 : vector<128xf32> to vector<1x128xf32>
    %cst_60 = arith.constant 8.000000e+00 : f32
    %127 = vector.broadcast %cst_60 : f32 to vector<1x128xf32>
    %128 = arith.divf %126, %127 : vector<1x128xf32>
    %129 = arith.mulf %124, %124 : vector<8x128xf32>
    %cst_61 = arith.constant dense<0.000000e+00> : vector<128xf32>
    %130 = vector.multi_reduction <add>, %129, %cst_61 [0] : vector<8x128xf32> to vector<128xf32>
    %131 = vector.shape_cast %130 : vector<128xf32> to vector<1x128xf32>
    %cst_62 = arith.constant 8.000000e+00 : f32
    %132 = vector.broadcast %cst_62 : f32 to vector<1x128xf32>
    %133 = arith.divf %131, %132 : vector<1x128xf32>
    %134 = arith.mulf %128, %128 : vector<1x128xf32>
    %135 = arith.subf %133, %134 : vector<1x128xf32>
    %cst_63 = arith.constant 0.000000e+00 : f32
    %136 = vector.broadcast %cst_63 : f32 to vector<1x128xf32>
    %137 = arith.maximumf %135, %136 : vector<1x128xf32>
    %138 = vector.broadcast %128 : vector<1x128xf32> to vector<8x128xf32>
    %139 = arith.subf %124, %138 : vector<8x128xf32>
    %cst_64 = arith.constant 9.99999974E-6 : f32
    %140 = vector.broadcast %cst_64 : f32 to vector<1x128xf32>
    %141 = arith.addf %137, %140 : vector<1x128xf32>
    %142 = math.rsqrt %141 : vector<1x128xf32>
    %143 = vector.broadcast %142 : vector<1x128xf32> to vector<8x128xf32>
    %144 = arith.mulf %139, %143 : vector<8x128xf32>
    %cst_65 = arith.constant 0.000000e+00 : f32
    %145 = vector.broadcast %cst_65 : f32 to vector<8x128xf32>
    %146 = arith.maximumf %144, %145 : vector<8x128xf32>
    %c5 = arith.constant 5 : index
    %c0_66 = arith.constant 0 : index
    %c0_67 = arith.constant 0 : index
    %147 = vector.load %arg1[%c5, %c0_66, %c0_67] : memref<7x128x128xf32, #tpu.memory_space<vmem>>, vector<1x128x128xf32>
    %148 = vector.shape_cast %147 : vector<1x128x128xf32> to vector<128x128xf32>
    %cst_68 = arith.constant dense<0.000000e+00> : vector<8x128xf32>
    %149 = tpu.matmul %146, %148, %cst_68 {dimension_numbers = #tpu.dot_dimension_numbers<[1], [0], [0], [1], [0, 0, 1, 1], [], []>} : vector<8x128xf32>, vector<128x128xf32>, vector<8x128xf32> -> vector<8x128xf32>
    %c5_69 = arith.constant 5 : index
    %c0_70 = arith.constant 0 : index
    %c0_71 = arith.constant 0 : index
    %150 = vector.load %arg2[%c5_69, %c0_70, %c0_71] : memref<7x1x128xf32, #tpu.memory_space<vmem>>, vector<1x1x128xf32>
    %151 = vector.shape_cast %150 : vector<1x1x128xf32> to vector<1x128xf32>
    %152 = vector.broadcast %151 : vector<1x128xf32> to vector<8x128xf32>
    %153 = arith.addf %149, %152 : vector<8x128xf32>
    %cst_72 = arith.constant dense<0.000000e+00> : vector<128xf32>
    %154 = vector.multi_reduction <add>, %153, %cst_72 [0] : vector<8x128xf32> to vector<128xf32>
    %155 = vector.shape_cast %154 : vector<128xf32> to vector<1x128xf32>
    %cst_73 = arith.constant 8.000000e+00 : f32
    %156 = vector.broadcast %cst_73 : f32 to vector<1x128xf32>
    %157 = arith.divf %155, %156 : vector<1x128xf32>
    %158 = arith.mulf %153, %153 : vector<8x128xf32>
    %cst_74 = arith.constant dense<0.000000e+00> : vector<128xf32>
    %159 = vector.multi_reduction <add>, %158, %cst_74 [0] : vector<8x128xf32> to vector<128xf32>
    %160 = vector.shape_cast %159 : vector<128xf32> to vector<1x128xf32>
    %cst_75 = arith.constant 8.000000e+00 : f32
    %161 = vector.broadcast %cst_75 : f32 to vector<1x128xf32>
    %162 = arith.divf %160, %161 : vector<1x128xf32>
    %163 = arith.mulf %157, %157 : vector<1x128xf32>
    %164 = arith.subf %162, %163 : vector<1x128xf32>
    %cst_76 = arith.constant 0.000000e+00 : f32
    %165 = vector.broadcast %cst_76 : f32 to vector<1x128xf32>
    %166 = arith.maximumf %164, %165 : vector<1x128xf32>
    %167 = vector.broadcast %157 : vector<1x128xf32> to vector<8x128xf32>
    %168 = arith.subf %153, %167 : vector<8x128xf32>
    %cst_77 = arith.constant 9.99999974E-6 : f32
    %169 = vector.broadcast %cst_77 : f32 to vector<1x128xf32>
    %170 = arith.addf %166, %169 : vector<1x128xf32>
    %171 = math.rsqrt %170 : vector<1x128xf32>
    %172 = vector.broadcast %171 : vector<1x128xf32> to vector<8x128xf32>
    %173 = arith.mulf %168, %172 : vector<8x128xf32>
    %174 = arith.addf %173, %117 : vector<8x128xf32>
    %175 = arith.addf %174, %58 : vector<8x128xf32>
    %cst_78 = arith.constant 0.000000e+00 : f32
    %176 = vector.broadcast %cst_78 : f32 to vector<8x128xf32>
    %177 = arith.maximumf %175, %176 : vector<8x128xf32>
    %cst_79 = arith.constant dense<0.000000e+00> : vector<128xf32>
    %178 = vector.multi_reduction <add>, %177, %cst_79 [0] : vector<8x128xf32> to vector<128xf32>
    %179 = vector.shape_cast %178 : vector<128xf32> to vector<1x128xf32>
    %cst_80 = arith.constant 8.000000e+00 : f32
    %180 = vector.broadcast %cst_80 : f32 to vector<1x128xf32>
    %181 = arith.divf %179, %180 : vector<1x128xf32>
    %182 = arith.mulf %177, %177 : vector<8x128xf32>
    %cst_81 = arith.constant dense<0.000000e+00> : vector<128xf32>
    %183 = vector.multi_reduction <add>, %182, %cst_81 [0] : vector<8x128xf32> to vector<128xf32>
    %184 = vector.shape_cast %183 : vector<128xf32> to vector<1x128xf32>
    %cst_82 = arith.constant 8.000000e+00 : f32
    %185 = vector.broadcast %cst_82 : f32 to vector<1x128xf32>
    %186 = arith.divf %184, %185 : vector<1x128xf32>
    %187 = arith.mulf %181, %181 : vector<1x128xf32>
    %188 = arith.subf %186, %187 : vector<1x128xf32>
    %cst_83 = arith.constant 0.000000e+00 : f32
    %189 = vector.broadcast %cst_83 : f32 to vector<1x128xf32>
    %190 = arith.maximumf %188, %189 : vector<1x128xf32>
    %191 = vector.broadcast %181 : vector<1x128xf32> to vector<8x128xf32>
    %192 = arith.subf %177, %191 : vector<8x128xf32>
    %cst_84 = arith.constant 9.99999974E-6 : f32
    %193 = vector.broadcast %cst_84 : f32 to vector<1x128xf32>
    %194 = arith.addf %190, %193 : vector<1x128xf32>
    %195 = math.rsqrt %194 : vector<1x128xf32>
    %196 = vector.broadcast %195 : vector<1x128xf32> to vector<8x128xf32>
    %197 = arith.mulf %192, %196 : vector<8x128xf32>
    %cst_85 = arith.constant 0.000000e+00 : f32
    %198 = vector.broadcast %cst_85 : f32 to vector<8x128xf32>
    %199 = arith.maximumf %197, %198 : vector<8x128xf32>
    %c6 = arith.constant 6 : index
    %c0_86 = arith.constant 0 : index
    %c0_87 = arith.constant 0 : index
    %200 = vector.load %arg1[%c6, %c0_86, %c0_87] : memref<7x128x128xf32, #tpu.memory_space<vmem>>, vector<1x128x128xf32>
    %201 = vector.shape_cast %200 : vector<1x128x128xf32> to vector<128x128xf32>
    %cst_88 = arith.constant dense<0.000000e+00> : vector<8x128xf32>
    %202 = tpu.matmul %199, %201, %cst_88 {dimension_numbers = #tpu.dot_dimension_numbers<[1], [0], [0], [1], [0, 0, 1, 1], [], []>} : vector<8x128xf32>, vector<128x128xf32>, vector<8x128xf32> -> vector<8x128xf32>
    %c6_89 = arith.constant 6 : index
    %c0_90 = arith.constant 0 : index
    %c0_91 = arith.constant 0 : index
    %203 = vector.load %arg2[%c6_89, %c0_90, %c0_91] : memref<7x1x128xf32, #tpu.memory_space<vmem>>, vector<1x1x128xf32>
    %204 = vector.shape_cast %203 : vector<1x1x128xf32> to vector<1x128xf32>
    %205 = vector.broadcast %204 : vector<1x128xf32> to vector<8x128xf32>
    %206 = arith.addf %202, %205 : vector<8x128xf32>
    %c0_92 = arith.constant 0 : index
    %c0_93 = arith.constant 0 : index
    %207 = vector.load %arg3[%c0_92, %c0_93] : memref<8x128xf32, #tpu.memory_space<vmem>>, vector<8x128xf32>
    tpu.vector_store %arg3[%c0_92, %c0_93], %206 {strides = array<i32>} : memref<8x128xf32, #tpu.memory_space<vmem>>, vector<8x128xf32>,
    return
  }
}

</mosaic_0001>

<bundles_post_ra>
// kernel: tpu_custom_call.1
= control target key start
LH: loop header
LB: loop body
LE: loop exit
PB: predicated region body
PF: predicated region fallthrough
CT: control target
= control target key end

     0   :  { %8 = vsyncpa [#allocation3], 0  ;;  %s1561_s0 = inlined_call_operand.hbm [shape: f32[8,128], index: 0, kind: input, shape index: {}]   ;;  %s1562_s1 = inlined_call_operand.hbm [shape: f32[7,128,128], index: 1, kind: input, shape index: {}]   ;;  %s1563_s2 = inlined_call_operand.hbm [shape: f32[7,1,128], index: 2, kind: input, shape index: {}]   ;;  %s1564_s3 = inlined_call_operand.hbm [shape: f32[8,128], index: 3, kind: output, shape index: {}]  }
   0x1   :  { %9 = vsyncpa [#allocation6], 0 }
   0x2   :  { %10 = vsyncpa [#allocation4], 0  ;;  %s1381_s12 = smov [#allocation5]  }
   0x3   :  { %s26_s13 = sshll.u32 %s1381_s12, 4  ;;  %s27_s13 = int_to_ptr.vmem [resolvable:$true] %s26_s13 }
   0x4   :  { %s1303_s14 = scalar_lea.vmem %s27_s13, 14336  ;;  %p1308_p1 = scmp.lt.s32.totalorder %s27_s13, %s27_s13 }
   0x5   :  { %p1304_p0 = scmp.ne.s32.totalorder %s27_s13, %s1303_s14  ;;  %p1309_p2 = scmp.lt.s32.totalorder %s1303_s14, %s1303_s14 }
   0x7   :  { %p1310_p3 = por %p1309_p2, %p1308_p1 }
   0x9   :  { %p1311_p4 = pnand %p1310_p3, %p1304_p0 }
   0xb   :  { %1314 = shalt.err (!%p1311_p4)
}
   0xc   :  { %s1382_s15 = smov 128   ;;  %s1383_s16 = smov 8  }
   0xd   :  { %32 = dma.hbm_to_vmem [thread:$0]  %s1562_s1, 14336, %s27_s13, [#allocation6], %s1382_s15, %s1382_s15, %s1383_s16  }
   0xe   :  { %s1384_s19 = smov [#allocation2]   ;;  %s1385_s21 = smov [#allocation7]  }
   0xf   :  { %s17_s20 = sshll.u32 %s1384_s19, 4  ;;  %s38_s22 = sshll.u32 %s1385_s21, 4  ;;  %s18_s20 = int_to_ptr.vmem [resolvable:$true] %s17_s20  ;;  %s39_s22 = int_to_ptr.vmem [resolvable:$true] %s38_s22 }
  0x10   :  { %s1323_s23 = scalar_lea.vmem %s18_s20, 128  ;;  %p1328_p6 = scmp.lt.s32.totalorder %s18_s20, %s18_s20 }
  0x11   :  { %p1324_p5 = scmp.ne.s32.totalorder %s18_s20, %s1323_s23  ;;  %p1329_p7 = scmp.lt.s32.totalorder %s1323_s23, %s1323_s23 }
  0x13   :  { %p1330_p8 = por %p1329_p7, %p1328_p6 }
  0x15   :  { %p1331_p9 = pnand %p1330_p8, %p1324_p5 }
  0x17   :  { %1334 = shalt.err (!%p1331_p9)
}
  0x18   :  { %20 = dma.hbm_to_vmem [thread:$0]  %s1561_s0, 128, %s18_s20, [#allocation3]  }
  0x19   :  { %s1343_s26 = scalar_lea.vmem %s39_s22, 112  ;;  %s1347_s1 = scalar_lea.vmem %s39_s22, 128 }
  0x1a   :  { %p1344_p10 = scmp.ne.s32.totalorder %s39_s22, %s1343_s26  ;;  %p1348_p11 = scmp.lt.s32.totalorder %s39_s22, %s39_s22 }
  0x1b   :  { %p1349_p12 = scmp.lt.s32.totalorder %s1347_s1, %s1343_s26 }
  0x1d   :  { %p1350_p13 = por %p1349_p12, %p1348_p11 }
  0x1f   :  { %p1351_p0 = pnand %p1350_p13, %p1344_p10 }
  0x21   :  { %1354 = shalt.err (!%p1351_p0)
}
  0x22   :  { %s1386_s27 = smov 16   ;;  %s1387_s28 = smov 1  }
  0x23   :  { %44 = dma.hbm_to_vmem [thread:$0]  %s1563_s2, 112, %s39_s22, [#allocation6], %s1386_s27, %s1386_s27, %s1387_s28  }
  0x24   :  { %1375 = dma.done.wait [#allocation3], 128  }
  0x25   :  { %1376 = vsyncadd [#allocation3], 4294967168 }
  0x26   :  { %1377 = dma.done.wait [#allocation6], 14448  }
  0x27   :  { %1378 = vsyncadd [#allocation6], 4294952848  ;;  %v1388_v0 = vmov 0.0   ;;  %vm1389_vm0 = vmmov 0   ;;  %v70_v1 = vld [vmem:[#allocation5 + $0x78] sm:$0xff]  ;;  %v69_v2 = vld [vmem:[#allocation5 + $0x70] sm:$0xff] }
  0x28   :  { %1026 = vmatprep.subr.mxu0 %v1388_v0  ;;  %1058 = vmatprep.mubr.msk.f32.mxu0 %vm1389_vm0, %v1388_v0  ;;  %v68_v3 = vld [vmem:[#allocation5 + $0x68] sm:$0xff]  ;;  %v67_v4 = vld [vmem:[#allocation5 + $0x60] sm:$0xff]  ;;  %v66_v5 = vld [vmem:[#allocation5 + $0x58] sm:$0xff]  ;;  %s1390_s0 = smov [#allocation8]  }
  0x29   :  { %1061 = vmatprep.subr.mxu1 %v1388_v0  ;;  %1093 = vmatprep.mubr.msk.f32.mxu1 %vm1389_vm0, %v1388_v0  ;;  %v65_v6 = vld [vmem:[#allocation5 + $0x50] sm:$0xff]  ;;  %v64_v7 = vld [vmem:[#allocation5 + $0x48] sm:$0xff]  ;;  %v63_v8 = vld [vmem:[#allocation5 + $0x40] sm:$0xff]  ;;  %s890_s2 = sshll.u32 %s1390_s0, 4  ;;  %s891_s2 = int_to_ptr.vmem [resolvable:$true] %s890_s2 }
  0x2a   :  { %1027 = vmatpush3.msra.mxu0 %v70_v1  ;;  %v62_v9 = vld [vmem:[#allocation5 + $0x38] sm:$0xff]  ;;  %v61_v10 = vld [vmem:[#allocation5 + $0x30] sm:$0xff]  ;;  %v60_v11 = vld [vmem:[#allocation5 + $0x28] sm:$0xff]  ;;  %s1355_s4 = scalar_lea.vmem %s891_s2, 128  ;;  %p1360_p2 = scmp.lt.s32.totalorder %s891_s2, %s891_s2 }
  0x2b   :  { %1028 = vmatprep.subr.mxu0 %v1388_v0  ;;  %v59_v12 = vld [vmem:[#allocation5 + $0x20] sm:$0xff]  ;;  %v58_v13 = vld [vmem:[#allocation5 + $0x18] sm:$0xff]  ;;  %v57_v14 = vld [vmem:[#allocation5 + $0x10] sm:$0xff]  ;;  %p1356_p1 = scmp.ne.s32.totalorder %s891_s2, %s1355_s4  ;;  %p1361_p3 = scmp.lt.s32.totalorder %s1355_s4, %s1355_s4 }
  0x2c   :  { %1029 = vmatpush3.msra.mxu0 %v69_v2  ;;  %v56_v15 = vld [vmem:[#allocation5 + $0x8] sm:$0xff]  ;;  %v55_v16 = vld [vmem:[#allocation5] sm:$0xff]  ;;  %v54_v17 = vld [vmem:[#allocation2] sm:$0xff] }
  0x2d   :  { %1030 = vmatprep.subr.mxu0 %v1388_v0  ;;  %v188_v18 = vld [vmem:[#allocation5 + $0xf8] sm:$0xff]  ;;  %v187_v19 = vld [vmem:[#allocation5 + $0xf0] sm:$0xff]  ;;  %v186_v20 = vld [vmem:[#allocation5 + $0xe8] sm:$0xff]  ;;  %p1362_p4 = por %p1361_p3, %p1360_p2 }
  0x2e   :  { %1031 = vmatpush3.msra.mxu0 %v68_v3  ;;  %1062 = vmatpush3.msra.mxu1 %v188_v18  ;;  %v185_v21 = vld [vmem:[#allocation5 + $0xe0] sm:$0xff]  ;;  %v184_v22 = vld [vmem:[#allocation5 + $0xd8] sm:$0xff]  ;;  %v183_v23 = vld [vmem:[#allocation5 + $0xd0] sm:$0xff] }
  0x2f   :  { %1032 = vmatprep.subr.mxu0 %v1388_v0  ;;  %1063 = vmatprep.subr.mxu1 %v1388_v0  ;;  %v182_v24 = vld [vmem:[#allocation5 + $0xc8] sm:$0xff]  ;;  %v181_v25 = vld [vmem:[#allocation5 + $0xc0] sm:$0xff]  ;;  %v180_v26 = vld [vmem:[#allocation5 + $0xb8] sm:$0xff]  ;;  %p1363_p5 = pnand %p1362_p4, %p1356_p1 }
  0x30   :  { %1033 = vmatpush3.msra.mxu0 %v67_v4  ;;  %1064 = vmatpush3.msra.mxu1 %v187_v19  ;;  %v179_v27 = vld [vmem:[#allocation5 + $0xb0] sm:$0xff]  ;;  %v178_v28 = vld [vmem:[#allocation5 + $0xa8] sm:$0xff]  ;;  %v177_v29 = vld [vmem:[#allocation5 + $0xa0] sm:$0xff] }
  0x31   :  { %1034 = vmatprep.subr.mxu0 %v1388_v0  ;;  %1065 = vmatprep.subr.mxu1 %v1388_v0  ;;  %v176_v30 = vld [vmem:[#allocation5 + $0x98] sm:$0xff]  ;;  %v175_v31 = vld [vmem:[#allocation5 + $0x90] sm:$0xff]  ;;  %v174_v32 = vld [vmem:[#allocation5 + $0x88] sm:$0xff] }
  0x32   :  { %1035 = vmatpush3.msra.mxu0 %v66_v5  ;;  %1066 = vmatpush3.msra.mxu1 %v186_v20  ;;  %v173_v33 = vld [vmem:[#allocation5 + $0x80] sm:$0xff]  ;;  %v306_v61 = vld [vmem:[#allocation5 + $0x178] sm:$0xff]  ;;  %v305_v62 = vld [vmem:[#allocation5 + $0x170] sm:$0xff] }
  0x33   :  { %1036 = vmatprep.subr.mxu0 %v1388_v0  ;;  %1067 = vmatprep.subr.mxu1 %v1388_v0  ;;  %v900_v34 = vld [vmem:[#allocation7] ss:$0 sm:$0xff]  ;;  %v304_v63 = vld [vmem:[#allocation5 + $0x168] sm:$0xff]  ;;  %v302_v2 = vld [vmem:[#allocation5 + $0x158] sm:$0xff] }
  0x34   :  { %1037 = vmatpush3.msra.mxu0 %v65_v6  ;;  %1068 = vmatpush3.msra.mxu1 %v185_v21  ;;  %v303_v1 = vld [vmem:[#allocation5 + $0x160] sm:$0xff]  ;;  %v301_v3 = vld [vmem:[#allocation5 + $0x150] sm:$0xff]  ;;  %v300_v4 = vld [vmem:[#allocation5 + $0x148] sm:$0xff] }
  0x35   :  { %1038 = vmatprep.subr.mxu0 %v1388_v0  ;;  %1069 = vmatprep.subr.mxu1 %v1388_v0  ;;  %v299_v5 = vld [vmem:[#allocation5 + $0x140] sm:$0xff]  ;;  %v298_v6 = vld [vmem:[#allocation5 + $0x138] sm:$0xff] }
  0x36   :  { %1039 = vmatpush3.msra.mxu0 %v64_v7  ;;  %1070 = vmatpush3.msra.mxu1 %v184_v22  ;;  %v297_v7 = vld [vmem:[#allocation5 + $0x130] sm:$0xff] }
  0x37   :  { %1040 = vmatprep.subr.mxu0 %v1388_v0  ;;  %1071 = vmatprep.subr.mxu1 %v1388_v0 }
  0x38   :  { %1041 = vmatpush3.msra.mxu0 %v63_v8  ;;  %1072 = vmatpush3.msra.mxu1 %v183_v23  ;;  %v296_v8 = vld [vmem:[#allocation5 + $0x128] sm:$0xff] }
  0x39   :  { %1042 = vmatprep.subr.mxu0 %v1388_v0  ;;  %1073 = vmatprep.subr.mxu1 %v1388_v0 }
  0x3a   :  { %1043 = vmatpush3.msra.mxu0 %v62_v9  ;;  %1074 = vmatpush3.msra.mxu1 %v182_v24  ;;  %v295_v9 = vld [vmem:[#allocation5 + $0x120] sm:$0xff] }
  0x3b   :  { %1044 = vmatprep.subr.mxu0 %v1388_v0  ;;  %1075 = vmatprep.subr.mxu1 %v1388_v0 }
  0x3c   :  { %1045 = vmatpush3.msra.mxu0 %v61_v10  ;;  %1076 = vmatpush3.msra.mxu1 %v181_v25  ;;  %v294_v10 = vld [vmem:[#allocation5 + $0x118] sm:$0xff] }
  0x3d   :  { %1046 = vmatprep.subr.mxu0 %v1388_v0  ;;  %1077 = vmatprep.subr.mxu1 %v1388_v0 }
  0x3e   :  { %1047 = vmatpush3.msra.mxu0 %v60_v11  ;;  %1078 = vmatpush3.msra.mxu1 %v180_v26  ;;  %v293_v11 = vld [vmem:[#allocation5 + $0x110] sm:$0xff] }
  0x3f   :  { %1048 = vmatprep.subr.mxu0 %v1388_v0  ;;  %1079 = vmatprep.subr.mxu1 %v1388_v0 }
  0x40   :  { %1049 = vmatpush3.msra.mxu0 %v59_v12  ;;  %1080 = vmatpush3.msra.mxu1 %v179_v27  ;;  %v292_v12 = vld [vmem:[#allocation5 + $0x108] sm:$0xff] }
  0x41   :  { %1050 = vmatprep.subr.mxu0 %v1388_v0  ;;  %1081 = vmatprep.subr.mxu1 %v1388_v0 }
  0x42   :  { %1051 = vmatpush3.msra.mxu0 %v58_v13  ;;  %1082 = vmatpush3.msra.mxu1 %v178_v28  ;;  %v291_v13 = vld [vmem:[#allocation5 + $0x100] sm:$0xff] }
  0x43   :  { %1052 = vmatprep.subr.mxu0 %v1388_v0  ;;  %1083 = vmatprep.subr.mxu1 %v1388_v0 }
  0x44   :  { %1053 = vmatpush3.msra.mxu0 %v57_v14  ;;  %1084 = vmatpush3.msra.mxu1 %v177_v29  ;;  %v901_v14 = vld [vmem:[#allocation7 + $0x1] ss:$0 sm:$0xff] }
  0x45   :  { %1054 = vmatprep.subr.mxu0 %v1388_v0  ;;  %1085 = vmatprep.subr.mxu1 %v1388_v0 }
  0x46   :  { %1055 = vmatpush3.msra.mxu0 %v56_v15  ;;  %1086 = vmatpush3.msra.mxu1 %v176_v30 }
  0x47   :  { %1056 = vmatprep.subr.mxu0 %v1388_v0  ;;  %1087 = vmatprep.subr.mxu1 %v1388_v0 }
  0x48   :  { %1057 = vmatpush3.msra.mxu0 %v55_v16  ;;  %1088 = vmatpush3.msra.mxu1 %v175_v31 }
  0x49   :  { %1059 = vmatmul.mubr.f32.vlgmr.msra.gmra.mxu0 %v54_v17  ;;  %1096 = vmatprep.subr.mxu0 %v1388_v0 }
  0x4a   :  { %1128 = vmatprep.mubr.msk.f32.mxu0 %vm1389_vm0, %v1388_v0  ;;  %1089 = vmatprep.subr.mxu1 %v1388_v0 }
  0x4b   :  { %1090 = vmatpush3.msra.mxu1 %v174_v32  ;;  %1097 = vmatpush3.msra.mxu0 %v306_v61 }
  0x4c   :  { %1091 = vmatprep.subr.mxu1 %v1388_v0  ;;  %1098 = vmatprep.subr.mxu0 %v1388_v0 }
  0x4d   :  { %1092 = vmatpush3.msra.mxu1 %v173_v33  ;;  %1099 = vmatpush3.msra.mxu0 %v305_v62 }
  0x4e   :  { %1131 = vmatprep.subr.mxu1 %v1388_v0  ;;  %1100 = vmatprep.subr.mxu0 %v1388_v0 }
  0x4f   :  { %1101 = vmatpush3.msra.mxu0 %v304_v63 }
  0x50   :  { %1102 = vmatprep.subr.mxu0 %v1388_v0 }
  0x51   :  { %1103 = vmatpush3.msra.mxu0 %v303_v1 }
  0x52   :  { %1104 = vmatprep.subr.mxu0 %v1388_v0 }
  0x53   :  { %1105 = vmatpush3.msra.mxu0 %v302_v2 }
  0x54   :  { %1106 = vmatprep.subr.mxu0 %v1388_v0 }
  0x55   :  { %1107 = vmatpush3.msra.mxu0 %v301_v3 }
  0x56   :  { %1108 = vmatprep.subr.mxu0 %v1388_v0 }
  0x57   :  { %1109 = vmatpush3.msra.mxu0 %v300_v4 }
  0x58   :  { %1110 = vmatprep.subr.mxu0 %v1388_v0 }
  0x59   :  { %1111 = vmatpush3.msra.mxu0 %v299_v5 }
  0x5a   :  { %1112 = vmatprep.subr.mxu0 %v1388_v0 }
  0x5b   :  { %1113 = vmatpush3.msra.mxu0 %v298_v6 }
  0x5c   :  { %1114 = vmatprep.subr.mxu0 %v1388_v0 }
  0x5d   :  { %1115 = vmatpush3.msra.mxu0 %v297_v7 }
  0x5e   :  { %1116 = vmatprep.subr.mxu0 %v1388_v0 }
  0x5f   :  { %1117 = vmatpush3.msra.mxu0 %v296_v8 }
  0x60   :  { %1118 = vmatprep.subr.mxu0 %v1388_v0 }
  0x61   :  { %1119 = vmatpush3.msra.mxu0 %v295_v9 }
  0x62   :  { %1120 = vmatprep.subr.mxu0 %v1388_v0 }
  0x63   :  { %1121 = vmatpush3.msra.mxu0 %v294_v10 }
  0x64   :  { %1122 = vmatprep.subr.mxu0 %v1388_v0 }
  0x65   :  { %1123 = vmatpush3.msra.mxu0 %v293_v11 }
  0x66   :  { %1124 = vmatprep.subr.mxu0 %v1388_v0 }
  0x67   :  { %1125 = vmatpush3.msra.mxu0 %v292_v12 }
  0x68   :  { %1126 = vmatprep.subr.mxu0 %v1388_v0 }
  0x69   :  { %1127 = vmatpush3.msra.mxu0 %v291_v13 }
  0x6a   :  { %1166 = vmatprep.subr.mxu0 %v1388_v0 }
 0x109   :  { %v144_v35 = vpop.f32.mrf.mxu0 }
 0x10a   :  { %v145_v36 = vadd.f32 %v900_v34, %v144_v35 }
 0x10b   :  { %v1060_v37 = vpop.f32.mrf.mxu0 }
 0x10c   :  { %v148_v38 = vrot.slane %v145_v36, 4  ;;  %v156_v39 = vmul.f32 %v145_v36, %v145_v36 }
 0x10e   :  { %v149_v40 = vadd.f32 %v148_v38, %v145_v36  ;;  %v157_v41 = vrot.slane %v156_v39, 4 }
 0x110   :  { %v150_v42 = vrot.slane %v149_v40, 2  ;;  %v158_v43 = vadd.f32 %v157_v41, %v156_v39  ;;  %v424_v41 = vld [vmem:[#allocation5 + $0x1f8] sm:$0xff] }
 0x112   :  { %v151_v44 = vadd.f32 %v150_v42, %v149_v40  ;;  %v159_v45 = vrot.slane %v158_v43, 2  ;;  %v423_v42 = vld [vmem:[#allocation5 + $0x1f0] sm:$0xff] }
 0x114   :  { %v160_v46 = vadd.f32 %v159_v45, %v158_v43  ;;  %v152_v47 = vrot.slane %v151_v44, 1  ;;  %v422_v43 = vld [vmem:[#allocation5 + $0x1e8] sm:$0xff]  ;;  %v420_v45 = vld [vmem:[#allocation5 + $0x1d8] sm:$0xff] }
 0x116   :  { %v161_v48 = vrot.slane %v160_v46, 1  ;;  %v153_v49 = vadd.f32 %v152_v47, %v151_v44  ;;  %v421_v44 = vld [vmem:[#allocation5 + $0x1e0] sm:$0xff]  ;;  %v418_v47 = vld [vmem:[#allocation5 + $0x1c8] sm:$0xff] }
 0x118   :  { %v162_v50 = vadd.f32 %v161_v48, %v160_v46  ;;  %v155_v51 = vmul.f32 0.125, %v153_v49  ;;  %v419_v46 = vld [vmem:[#allocation5 + $0x1d0] sm:$0xff]  ;;  %v417_v48 = vld [vmem:[#allocation5 + $0x1c0] sm:$0xff]  ;;  %v416_v49 = vld [vmem:[#allocation5 + $0x1b8] sm:$0xff] }
 0x11a   :  { %v163_v52 = vmul.f32 0.125, %v162_v50  ;;  %v164_v53 = vmul.f32 %v155_v51, %v155_v51  ;;  %v167_v57 = vsub.f32 %v145_v36, %v155_v51  ;;  %v415_v50 = vld [vmem:[#allocation5 + $0x1b0] sm:$0xff]  ;;  %v414_v51 = vld [vmem:[#allocation5 + $0x1a8] sm:$0xff] }
 0x11c   :  { %v165_v54 = vsub.f32 %v163_v52, %v164_v53  ;;  %v413_v52 = vld [vmem:[#allocation5 + $0x1a0] sm:$0xff]  ;;  %v412_v53 = vld [vmem:[#allocation5 + $0x198] sm:$0xff] }
 0x11e   :  { %v166_v55 = vmax.f32 %v165_v54, 0.0  ;;  %v411_v54 = vld [vmem:[#allocation5 + $0x190] sm:$0xff] }
 0x120   :  { %v168_v56 = vadd.f32 1e-05, %v166_v55  ;;  %v410_v55 = vld [vmem:[#allocation5 + $0x188] sm:$0xff] }
 0x122   :  { %1281 = vrsqrt.f32 %v168_v56  ;;  %v409_v56 = vld [vmem:[#allocation5 + $0x180] sm:$0xff] }
 0x12f   :  { %v1282_v58 = vpop.eup %1281 }
 0x130   :  { %v170_v59 = vmul.f32 %v1282_v58, %v167_v57  ;;  %v902_v57 = vld [vmem:[#allocation7 + $0x2] ss:$0 sm:$0xff] }
 0x132   :  { %v171_v60 = vmax.f32 %v170_v59, 0.0 }
 0x134   :  { %1094 = vmatmul.mubr.f32.vlgmr.msra.gmra.mxu1 %v171_v60 }
 0x135   :  { %1163 = vmatprep.mubr.msk.f32.mxu1 %vm1389_vm0, %v1388_v0  ;;  %1132 = vmatpush3.msra.mxu1 %v424_v41 }
 0x136   :  { %1133 = vmatprep.subr.mxu1 %v1388_v0 }
 0x137   :  { %1134 = vmatpush3.msra.mxu1 %v423_v42 }
 0x138   :  { %1135 = vmatprep.subr.mxu1 %v1388_v0 }
 0x139   :  { %1136 = vmatpush3.msra.mxu1 %v422_v43 }
 0x13a   :  { %1137 = vmatprep.subr.mxu1 %v1388_v0 }
 0x13b   :  { %1138 = vmatpush3.msra.mxu1 %v421_v44 }
 0x13c   :  { %1139 = vmatprep.subr.mxu1 %v1388_v0 }
 0x13d   :  { %1140 = vmatpush3.msra.mxu1 %v420_v45 }
 0x13e   :  { %1141 = vmatprep.subr.mxu1 %v1388_v0 }
 0x13f   :  { %1142 = vmatpush3.msra.mxu1 %v419_v46 }
 0x140   :  { %1143 = vmatprep.subr.mxu1 %v1388_v0 }
 0x141   :  { %1144 = vmatpush3.msra.mxu1 %v418_v47 }
 0x142   :  { %1145 = vmatprep.subr.mxu1 %v1388_v0 }
 0x143   :  { %1146 = vmatpush3.msra.mxu1 %v417_v48 }
 0x144   :  { %1147 = vmatprep.subr.mxu1 %v1388_v0 }
 0x145   :  { %1148 = vmatpush3.msra.mxu1 %v416_v49 }
 0x146   :  { %1149 = vmatprep.subr.mxu1 %v1388_v0 }
 0x147   :  { %1150 = vmatpush3.msra.mxu1 %v415_v50 }
 0x148   :  { %1151 = vmatprep.subr.mxu1 %v1388_v0 }
 0x149   :  { %1152 = vmatpush3.msra.mxu1 %v414_v51 }
 0x14a   :  { %1153 = vmatprep.subr.mxu1 %v1388_v0 }
 0x14b   :  { %1154 = vmatpush3.msra.mxu1 %v413_v52 }
 0x14c   :  { %1155 = vmatprep.subr.mxu1 %v1388_v0 }
 0x14d   :  { %1156 = vmatpush3.msra.mxu1 %v412_v53 }
 0x14e   :  { %1157 = vmatprep.subr.mxu1 %v1388_v0 }
 0x14f   :  { %1158 = vmatpush3.msra.mxu1 %v411_v54 }
 0x150   :  { %1159 = vmatprep.subr.mxu1 %v1388_v0 }
 0x151   :  { %1160 = vmatpush3.msra.mxu1 %v410_v55 }
 0x152   :  { %1161 = vmatprep.subr.mxu1 %v1388_v0 }
 0x153   :  { %1162 = vmatpush3.msra.mxu1 %v409_v56 }
 0x154   :  { %1201 = vmatprep.subr.mxu1 %v1388_v0 }
 0x1f4   :  { %v263_v15 = vpop.f32.mrf.mxu1 }
 0x1f5   :  { %v264_v16 = vadd.f32 %v901_v14, %v263_v15 }
 0x1f6   :  { %v1095_v17 = vpop.f32.mrf.mxu1 }
 0x1f7   :  { %v267_v18 = vrot.slane %v264_v16, 4  ;;  %v274_v19 = vmul.f32 %v264_v16, %v264_v16 }
 0x1f9   :  { %v268_v20 = vadd.f32 %v267_v18, %v264_v16  ;;  %v275_v21 = vrot.slane %v274_v19, 4 }
 0x1fb   :  { %v269_v22 = vrot.slane %v268_v20, 2  ;;  %v276_v23 = vadd.f32 %v275_v21, %v274_v19  ;;  %v543_v21 = vld [vmem:[#allocation5 + $0x278] sm:$0xff] }
 0x1fd   :  { %v270_v24 = vadd.f32 %v269_v22, %v268_v20  ;;  %v277_v25 = vrot.slane %v276_v23, 2  ;;  %v542_v22 = vld [vmem:[#allocation5 + $0x270] sm:$0xff] }
 0x1ff   :  { %v271_v26 = vrot.slane %v270_v24, 1  ;;  %v278_v27 = vadd.f32 %v277_v25, %v276_v23  ;;  %v541_v23 = vld [vmem:[#allocation5 + $0x268] sm:$0xff]  ;;  %v539_v25 = vld [vmem:[#allocation5 + $0x258] sm:$0xff] }
 0x201   :  { %v272_v28 = vadd.f32 %v271_v26, %v270_v24  ;;  %v279_v29 = vrot.slane %v278_v27, 1  ;;  %v540_v24 = vld [vmem:[#allocation5 + $0x260] sm:$0xff]  ;;  %v538_v26 = vld [vmem:[#allocation5 + $0x250] sm:$0xff] }
 0x203   :  { %v273_v30 = vmul.f32 0.125, %v272_v28  ;;  %v280_v31 = vadd.f32 %v279_v29, %v278_v27  ;;  %v537_v27 = vld [vmem:[#allocation5 + $0x248] sm:$0xff]  ;;  %v536_v28 = vld [vmem:[#allocation5 + $0x240] sm:$0xff]  ;;  %v535_v29 = vld [vmem:[#allocation5 + $0x238] sm:$0xff] }
 0x205   :  { %v281_v32 = vmul.f32 0.125, %v280_v31  ;;  %v282_v33 = vmul.f32 %v273_v30, %v273_v30  ;;  %v285_v37 = vsub.f32 %v264_v16, %v273_v30  ;;  %v534_v30 = vld [vmem:[#allocation5 + $0x230] sm:$0xff]  ;;  %v533_v31 = vld [vmem:[#allocation5 + $0x228] sm:$0xff] }
 0x207   :  { %v283_v34 = vsub.f32 %v281_v32, %v282_v33  ;;  %v532_v32 = vld [vmem:[#allocation5 + $0x220] sm:$0xff]  ;;  %v531_v33 = vld [vmem:[#allocation5 + $0x218] sm:$0xff] }
 0x209   :  { %v284_v35 = vmax.f32 %v283_v34, 0.0  ;;  %v530_v34 = vld [vmem:[#allocation5 + $0x210] sm:$0xff] }
 0x20b   :  { %v286_v36 = vadd.f32 1e-05, %v284_v35  ;;  %v529_v35 = vld [vmem:[#allocation5 + $0x208] sm:$0xff] }
 0x20d   :  { %1283 = vrsqrt.f32 %v286_v36  ;;  %v528_v36 = vld [vmem:[#allocation5 + $0x200] sm:$0xff] }
 0x21a   :  { %v1284_v38 = vpop.eup %1283 }
 0x21b   :  { %v288_v39 = vmul.f32 %v1284_v38, %v285_v37  ;;  %v903_v37 = vld [vmem:[#allocation7 + $0x3] ss:$0 sm:$0xff] }
 0x21d   :  { %v1478_v40 = vmax.f32 %v288_v39, 0.0 }
 0x21f   :  { %1129 = vmatmul.mubr.f32.vlgmr.msra.gmra.mxu0 %v1478_v40 }
 0x220   :  { %1198 = vmatprep.mubr.msk.f32.mxu0 %vm1389_vm0, %v1388_v0  ;;  %1167 = vmatpush3.msra.mxu0 %v543_v21 }
 0x221   :  { %1168 = vmatprep.subr.mxu0 %v1388_v0 }
 0x222   :  { %1169 = vmatpush3.msra.mxu0 %v542_v22 }
 0x223   :  { %1170 = vmatprep.subr.mxu0 %v1388_v0 }
 0x224   :  { %1171 = vmatpush3.msra.mxu0 %v541_v23 }
 0x225   :  { %1172 = vmatprep.subr.mxu0 %v1388_v0 }
 0x226   :  { %1173 = vmatpush3.msra.mxu0 %v540_v24 }
 0x227   :  { %1174 = vmatprep.subr.mxu0 %v1388_v0 }
 0x228   :  { %1175 = vmatpush3.msra.mxu0 %v539_v25 }
 0x229   :  { %1176 = vmatprep.subr.mxu0 %v1388_v0 }
 0x22a   :  { %1177 = vmatpush3.msra.mxu0 %v538_v26 }
 0x22b   :  { %1178 = vmatprep.subr.mxu0 %v1388_v0 }
 0x22c   :  { %1179 = vmatpush3.msra.mxu0 %v537_v27 }
 0x22d   :  { %1180 = vmatprep.subr.mxu0 %v1388_v0 }
 0x22e   :  { %1181 = vmatpush3.msra.mxu0 %v536_v28 }
 0x22f   :  { %1182 = vmatprep.subr.mxu0 %v1388_v0 }
 0x230   :  { %1183 = vmatpush3.msra.mxu0 %v535_v29 }
 0x231   :  { %1184 = vmatprep.subr.mxu0 %v1388_v0 }
 0x232   :  { %1185 = vmatpush3.msra.mxu0 %v534_v30 }
 0x233   :  { %1186 = vmatprep.subr.mxu0 %v1388_v0 }
 0x234   :  { %1187 = vmatpush3.msra.mxu0 %v533_v31 }
 0x235   :  { %1188 = vmatprep.subr.mxu0 %v1388_v0 }
 0x236   :  { %1189 = vmatpush3.msra.mxu0 %v532_v32 }
 0x237   :  { %1190 = vmatprep.subr.mxu0 %v1388_v0 }
 0x238   :  { %1191 = vmatpush3.msra.mxu0 %v531_v33 }
 0x239   :  { %1192 = vmatprep.subr.mxu0 %v1388_v0 }
 0x23a   :  { %1193 = vmatpush3.msra.mxu0 %v530_v34 }
 0x23b   :  { %1194 = vmatprep.subr.mxu0 %v1388_v0 }
 0x23c   :  { %1195 = vmatpush3.msra.mxu0 %v529_v35 }
 0x23d   :  { %1196 = vmatprep.subr.mxu0 %v1388_v0 }
 0x23e   :  { %1197 = vmatpush3.msra.mxu0 %v528_v36 }
 0x23f   :  { %1236 = vmatprep.subr.mxu0 %v1388_v0 }
 0x2df   :  { %v381_v58 = vpop.f32.mrf.mxu0 }
 0x2e0   :  { %v382_v59 = vadd.f32 %v902_v57, %v381_v58 }
 0x2e1   :  { %v1130_v60 = vpop.f32.mrf.mxu0 }
 0x2e2   :  { %v385_v61 = vrot.slane %v382_v59, 4  ;;  %v392_v62 = vmul.f32 %v382_v59, %v382_v59 }
 0x2e4   :  { %v386_v63 = vadd.f32 %v385_v61, %v382_v59  ;;  %v393_v1 = vrot.slane %v392_v62, 4 }
 0x2e6   :  { %v387_v2 = vrot.slane %v386_v63, 2  ;;  %v394_v3 = vadd.f32 %v393_v1, %v392_v62 }
 0x2e8   :  { %v388_v4 = vadd.f32 %v387_v2, %v386_v63  ;;  %v395_v5 = vrot.slane %v394_v3, 2 }
 0x2ea   :  { %v389_v6 = vrot.slane %v388_v4, 1  ;;  %v396_v7 = vadd.f32 %v395_v5, %v394_v3  ;;  %v661_v3 = vld [vmem:[#allocation5 + $0x2f8] sm:$0xff]  ;;  %v659_v5 = vld [vmem:[#allocation5 + $0x2e8] sm:$0xff] }
 0x2ec   :  { %v390_v8 = vadd.f32 %v389_v6, %v388_v4  ;;  %v397_v9 = vrot.slane %v396_v7, 1  ;;  %v660_v4 = vld [vmem:[#allocation5 + $0x2f0] sm:$0xff]  ;;  %v658_v6 = vld [vmem:[#allocation5 + $0x2e0] sm:$0xff] }
 0x2ee   :  { %v391_v10 = vmul.f32 0.125, %v390_v8  ;;  %v398_v11 = vadd.f32 %v397_v9, %v396_v7  ;;  %v657_v7 = vld [vmem:[#allocation5 + $0x2d8] sm:$0xff]  ;;  %v656_v8 = vld [vmem:[#allocation5 + $0x2d0] sm:$0xff]  ;;  %v655_v9 = vld [vmem:[#allocation5 + $0x2c8] sm:$0xff] }
 0x2f0   :  { %v399_v12 = vmul.f32 0.125, %v398_v11  ;;  %v400_v13 = vmul.f32 %v391_v10, %v391_v10  ;;  %v403_v17 = vsub.f32 %v382_v59, %v391_v10  ;;  %v654_v10 = vld [vmem:[#allocation5 + $0x2c0] sm:$0xff]  ;;  %v653_v11 = vld [vmem:[#allocation5 + $0x2b8] sm:$0xff] }
 0x2f2   :  { %v401_v14 = vsub.f32 %v399_v12, %v400_v13  ;;  %v652_v12 = vld [vmem:[#allocation5 + $0x2b0] sm:$0xff]  ;;  %v651_v13 = vld [vmem:[#allocation5 + $0x2a8] sm:$0xff] }
 0x2f4   :  { %v402_v15 = vmax.f32 %v401_v14, 0.0  ;;  %v650_v14 = vld [vmem:[#allocation5 + $0x2a0] sm:$0xff] }
 0x2f6   :  { %v404_v16 = vadd.f32 1e-05, %v402_v15  ;;  %v649_v15 = vld [vmem:[#allocation5 + $0x298] sm:$0xff] }
 0x2f8   :  { %1285 = vrsqrt.f32 %v404_v16  ;;  %v648_v16 = vld [vmem:[#allocation5 + $0x290] sm:$0xff] }
 0x305   :  { %v1286_v18 = vpop.eup %1285 }
 0x306   :  { %v406_v19 = vmul.f32 %v1286_v18, %v403_v17  ;;  %v647_v17 = vld [vmem:[#allocation5 + $0x288] sm:$0xff]  ;;  %v646_v18 = vld [vmem:[#allocation5 + $0x280] sm:$0xff] }
 0x308   :  { %v407_v20 = vmax.f32 %v406_v19, 0.0  ;;  %v904_v19 = vld [vmem:[#allocation7 + $0x4] ss:$0 sm:$0xff] }
 0x30a   :  { %1164 = vmatmul.mubr.f32.vlgmr.msra.gmra.mxu1 %v407_v20 }
 0x30b   :  { %1233 = vmatprep.mubr.msk.f32.mxu1 %vm1389_vm0, %v1388_v0  ;;  %1202 = vmatpush3.msra.mxu1 %v661_v3 }
 0x30c   :  { %1203 = vmatprep.subr.mxu1 %v1388_v0 }
 0x30d   :  { %1204 = vmatpush3.msra.mxu1 %v660_v4 }
 0x30e   :  { %1205 = vmatprep.subr.mxu1 %v1388_v0 }
 0x30f   :  { %1206 = vmatpush3.msra.mxu1 %v659_v5 }
 0x310   :  { %1207 = vmatprep.subr.mxu1 %v1388_v0 }
 0x311   :  { %1208 = vmatpush3.msra.mxu1 %v658_v6 }
 0x312   :  { %1209 = vmatprep.subr.mxu1 %v1388_v0 }
 0x313   :  { %1210 = vmatpush3.msra.mxu1 %v657_v7 }
 0x314   :  { %1211 = vmatprep.subr.mxu1 %v1388_v0 }
 0x315   :  { %1212 = vmatpush3.msra.mxu1 %v656_v8 }
 0x316   :  { %1213 = vmatprep.subr.mxu1 %v1388_v0 }
 0x317   :  { %1214 = vmatpush3.msra.mxu1 %v655_v9 }
 0x318   :  { %1215 = vmatprep.subr.mxu1 %v1388_v0 }
 0x319   :  { %1216 = vmatpush3.msra.mxu1 %v654_v10 }
 0x31a   :  { %1217 = vmatprep.subr.mxu1 %v1388_v0 }
 0x31b   :  { %1218 = vmatpush3.msra.mxu1 %v653_v11 }
 0x31c   :  { %1219 = vmatprep.subr.mxu1 %v1388_v0 }
 0x31d   :  { %1220 = vmatpush3.msra.mxu1 %v652_v12 }
 0x31e   :  { %1221 = vmatprep.subr.mxu1 %v1388_v0 }
 0x31f   :  { %1222 = vmatpush3.msra.mxu1 %v651_v13 }
 0x320   :  { %1223 = vmatprep.subr.mxu1 %v1388_v0 }
 0x321   :  { %1224 = vmatpush3.msra.mxu1 %v650_v14 }
 0x322   :  { %1225 = vmatprep.subr.mxu1 %v1388_v0 }
 0x323   :  { %1226 = vmatpush3.msra.mxu1 %v649_v15 }
 0x324   :  { %1227 = vmatprep.subr.mxu1 %v1388_v0 }
 0x325   :  { %1228 = vmatpush3.msra.mxu1 %v648_v16 }
 0x326   :  { %1229 = vmatprep.subr.mxu1 %v1388_v0 }
 0x327   :  { %1230 = vmatpush3.msra.mxu1 %v647_v17 }
 0x328   :  { %1231 = vmatprep.subr.mxu1 %v1388_v0 }
 0x329   :  { %1232 = vmatpush3.msra.mxu1 %v646_v18 }
 0x3ca   :  { %v499_v38 = vpop.f32.mrf.mxu1 }
 0x3cb   :  { %v500_v39 = vadd.f32 %v903_v37, %v499_v38 }
 0x3cc   :  { %v1165_v41 = vpop.f32.mrf.mxu1 }
 0x3cd   :  { %v503_v42 = vrot.slane %v500_v39, 4  ;;  %v510_v43 = vmul.f32 %v500_v39, %v500_v39 }
 0x3cf   :  { %v504_v44 = vadd.f32 %v503_v42, %v500_v39  ;;  %v511_v45 = vrot.slane %v510_v43, 4 }
 0x3d1   :  { %v505_v46 = vrot.slane %v504_v44, 2  ;;  %v512_v47 = vadd.f32 %v511_v45, %v510_v43 }
 0x3d3   :  { %v506_v48 = vadd.f32 %v505_v46, %v504_v44  ;;  %v513_v49 = vrot.slane %v512_v47, 2 }
 0x3d5   :  { %v507_v50 = vrot.slane %v506_v48, 1  ;;  %v514_v51 = vadd.f32 %v513_v49, %v512_v47  ;;  %v804_v47 = vld [vmem:[#allocation5 + $0x378] sm:$0xff]  ;;  %v802_v49 = vld [vmem:[#allocation5 + $0x368] sm:$0xff] }
 0x3d7   :  { %v508_v52 = vadd.f32 %v507_v50, %v506_v48  ;;  %v515_v53 = vrot.slane %v514_v51, 1  ;;  %v803_v48 = vld [vmem:[#allocation5 + $0x370] sm:$0xff]  ;;  %v801_v50 = vld [vmem:[#allocation5 + $0x360] sm:$0xff] }
 0x3d9   :  { %v509_v54 = vmul.f32 0.125, %v508_v52  ;;  %v516_v55 = vadd.f32 %v515_v53, %v514_v51  ;;  %v800_v51 = vld [vmem:[#allocation5 + $0x358] sm:$0xff]  ;;  %v799_v52 = vld [vmem:[#allocation5 + $0x350] sm:$0xff]  ;;  %v798_v53 = vld [vmem:[#allocation5 + $0x348] sm:$0xff] }
 0x3db   :  { %v517_v56 = vmul.f32 0.125, %v516_v55  ;;  %v518_v57 = vmul.f32 %v509_v54, %v509_v54  ;;  %v521_v61 = vsub.f32 %v500_v39, %v509_v54  ;;  %v797_v54 = vld [vmem:[#allocation5 + $0x340] sm:$0xff]  ;;  %v796_v55 = vld [vmem:[#allocation5 + $0x338] sm:$0xff] }
 0x3dd   :  { %v519_v58 = vsub.f32 %v517_v56, %v518_v57  ;;  %v795_v56 = vld [vmem:[#allocation5 + $0x330] sm:$0xff]  ;;  %v794_v57 = vld [vmem:[#allocation5 + $0x328] sm:$0xff] }
 0x3df   :  { %v520_v59 = vmax.f32 %v519_v58, 0.0  ;;  %v793_v58 = vld [vmem:[#allocation5 + $0x320] sm:$0xff] }
 0x3e1   :  { %v522_v60 = vadd.f32 1e-05, %v520_v59  ;;  %v792_v59 = vld [vmem:[#allocation5 + $0x318] sm:$0xff] }
 0x3e3   :  { %1287 = vrsqrt.f32 %v522_v60  ;;  %v791_v60 = vld [vmem:[#allocation5 + $0x310] sm:$0xff] }
 0x3f0   :  { %v1288_v62 = vpop.eup %1287 }
 0x3f1   :  { %v524_v63 = vmul.f32 %v1288_v62, %v521_v61  ;;  %v790_v61 = vld [vmem:[#allocation5 + $0x308] sm:$0xff]  ;;  %v789_v62 = vld [vmem:[#allocation5 + $0x300] sm:$0xff] }
 0x3f3   :  { %v1518_v1 = vadd.f32 %v524_v63, %v1478_v40  ;;  %v905_v63 = vld [vmem:[#allocation7 + $0x5] ss:$0 sm:$0xff] }
 0x3f5   :  { %v526_v2 = vmax.f32 %v1518_v1, 0.0 }
 0x3f7   :  { %1199 = vmatmul.mubr.f32.vlgmr.msra.gmra.mxu0 %v526_v2 }
 0x3f8   :  { %1268 = vmatprep.mubr.msk.f32.mxu0 %vm1389_vm0, %v1388_v0  ;;  %1237 = vmatpush3.msra.mxu0 %v804_v47 }
 0x3f9   :  { %1238 = vmatprep.subr.mxu0 %v1388_v0 }
 0x3fa   :  { %1239 = vmatpush3.msra.mxu0 %v803_v48 }
 0x3fb   :  { %1240 = vmatprep.subr.mxu0 %v1388_v0 }
 0x3fc   :  { %1241 = vmatpush3.msra.mxu0 %v802_v49 }
 0x3fd   :  { %1242 = vmatprep.subr.mxu0 %v1388_v0 }
 0x3fe   :  { %1243 = vmatpush3.msra.mxu0 %v801_v50 }
 0x3ff   :  { %1244 = vmatprep.subr.mxu0 %v1388_v0 }
 0x400   :  { %1245 = vmatpush3.msra.mxu0 %v800_v51  ;;  %v906_v51 = vld [vmem:[#allocation7 + $0x6] ss:$0 sm:$0xff] }
 0x401   :  { %1246 = vmatprep.subr.mxu0 %v1388_v0 }
 0x402   :  { %1247 = vmatpush3.msra.mxu0 %v799_v52 }
 0x403   :  { %1248 = vmatprep.subr.mxu0 %v1388_v0 }
 0x404   :  { %1249 = vmatpush3.msra.mxu0 %v798_v53 }
 0x405   :  { %1250 = vmatprep.subr.mxu0 %v1388_v0 }
 0x406   :  { %1251 = vmatpush3.msra.mxu0 %v797_v54 }
 0x407   :  { %1252 = vmatprep.subr.mxu0 %v1388_v0 }
 0x408   :  { %1253 = vmatpush3.msra.mxu0 %v796_v55 }
 0x409   :  { %1254 = vmatprep.subr.mxu0 %v1388_v0 }
 0x40a   :  { %1255 = vmatpush3.msra.mxu0 %v795_v56 }
 0x40b   :  { %1256 = vmatprep.subr.mxu0 %v1388_v0 }
 0x40c   :  { %1257 = vmatpush3.msra.mxu0 %v794_v57 }
 0x40d   :  { %1258 = vmatprep.subr.mxu0 %v1388_v0 }
 0x40e   :  { %1259 = vmatpush3.msra.mxu0 %v793_v58 }
 0x40f   :  { %1260 = vmatprep.subr.mxu0 %v1388_v0 }
 0x410   :  { %1261 = vmatpush3.msra.mxu0 %v792_v59 }
 0x411   :  { %1262 = vmatprep.subr.mxu0 %v1388_v0 }
 0x412   :  { %1263 = vmatpush3.msra.mxu0 %v791_v60 }
 0x413   :  { %1264 = vmatprep.subr.mxu0 %v1388_v0 }
 0x414   :  { %1265 = vmatpush3.msra.mxu0 %v790_v61 }
 0x415   :  { %1266 = vmatprep.subr.mxu0 %v1388_v0 }
 0x416   :  { %1267 = vmatpush3.msra.mxu0 %v789_v62 }
 0x4b7   :  { %v618_v20 = vpop.f32.mrf.mxu0 }
 0x4b8   :  { %v619_v21 = vadd.f32 %v904_v19, %v618_v20 }
 0x4b9   :  { %v1200_v22 = vpop.f32.mrf.mxu0 }
 0x4ba   :  { %v622_v23 = vrot.slane %v619_v21, 4  ;;  %v629_v24 = vmul.f32 %v619_v21, %v619_v21 }
 0x4bc   :  { %v623_v25 = vadd.f32 %v622_v23, %v619_v21  ;;  %v630_v26 = vrot.slane %v629_v24, 4 }
 0x4be   :  { %v624_v27 = vrot.slane %v623_v25, 2  ;;  %v631_v28 = vadd.f32 %v630_v26, %v629_v24 }
 0x4c0   :  { %v625_v29 = vadd.f32 %v624_v27, %v623_v25  ;;  %v632_v30 = vrot.slane %v631_v28, 2 }
 0x4c2   :  { %v626_v31 = vrot.slane %v625_v29, 1  ;;  %v633_v32 = vadd.f32 %v632_v30, %v631_v28 }
 0x4c4   :  { %v627_v33 = vadd.f32 %v626_v31, %v625_v29  ;;  %v634_v34 = vrot.slane %v633_v32, 1 }
 0x4c6   :  { %v628_v35 = vmul.f32 0.125, %v627_v33  ;;  %v635_v36 = vadd.f32 %v634_v34, %v633_v32 }
 0x4c8   :  { %v636_v37 = vmul.f32 0.125, %v635_v36  ;;  %v637_v38 = vmul.f32 %v628_v35, %v628_v35  ;;  %v640_v43 = vsub.f32 %v619_v21, %v628_v35 }
 0x4ca   :  { %v638_v39 = vsub.f32 %v636_v37, %v637_v38 }
 0x4cc   :  { %v639_v41 = vmax.f32 %v638_v39, 0.0 }
 0x4ce   :  { %v641_v42 = vadd.f32 1e-05, %v639_v41 }
 0x4d0   :  { %1289 = vrsqrt.f32 %v641_v42 }
 0x4dd   :  { %v1290_v44 = vpop.eup %1289 }
 0x4de   :  { %v643_v45 = vmul.f32 %v1290_v44, %v640_v43 }
 0x4e0   :  { %v644_v46 = vmax.f32 %v643_v45, 0.0 }
 0x4e2   :  { %1234 = vmatmul.mubr.f32.vlgmr.msra.gmra.mxu1 %v644_v46 }
 0x5a2   :  { %v736_v3 = vpop.f32.mrf.mxu1 }
 0x5a3   :  { %v737_v4 = vadd.f32 %v905_v63, %v736_v3 }
 0x5a4   :  { %v1235_v5 = vpop.f32.mrf.mxu1 }
 0x5a5   :  { %v740_v6 = vrot.slane %v737_v4, 4  ;;  %v747_v7 = vmul.f32 %v737_v4, %v737_v4 }
 0x5a7   :  { %v741_v8 = vadd.f32 %v740_v6, %v737_v4  ;;  %v748_v9 = vrot.slane %v747_v7, 4 }
 0x5a9   :  { %v742_v10 = vrot.slane %v741_v8, 2  ;;  %v749_v11 = vadd.f32 %v748_v9, %v747_v7 }
 0x5ab   :  { %v743_v12 = vadd.f32 %v742_v10, %v741_v8  ;;  %v750_v13 = vrot.slane %v749_v11, 2 }
 0x5ad   :  { %v744_v14 = vrot.slane %v743_v12, 1  ;;  %v751_v15 = vadd.f32 %v750_v13, %v749_v11 }
 0x5af   :  { %v745_v16 = vadd.f32 %v744_v14, %v743_v12  ;;  %v752_v17 = vrot.slane %v751_v15, 1 }
 0x5b1   :  { %v746_v18 = vmul.f32 0.125, %v745_v16  ;;  %v753_v19 = vadd.f32 %v752_v17, %v751_v15 }
 0x5b3   :  { %v754_v0 = vmul.f32 0.125, %v753_v19  ;;  %v755_v20 = vmul.f32 %v746_v18, %v746_v18  ;;  %v758_v24 = vsub.f32 %v737_v4, %v746_v18 }
 0x5b5   :  { %v756_v21 = vsub.f32 %v754_v0, %v755_v20 }
 0x5b7   :  { %v757_v22 = vmax.f32 %v756_v21, 0.0 }
 0x5b9   :  { %v759_v23 = vadd.f32 1e-05, %v757_v22 }
 0x5bb   :  { %1291 = vrsqrt.f32 %v759_v23 }
 0x5c8   :  { %v1292_v25 = vpop.eup %1291 }
 0x5c9   :  { %v761_v26 = vmul.f32 %v1292_v25, %v758_v24 }
 0x5cb   :  { %v762_v27 = vadd.f32 %v761_v26, %v526_v2 }
 0x5cd   :  { %v763_v28 = vadd.f32 %v762_v27, %v1478_v40 }
 0x5cf   :  { %v764_v29 = vmax.f32 %v763_v28, 0.0 }
 0x5d1   :  { %v772_v30 = vmul.f32 %v764_v29, %v764_v29  ;;  %v765_v31 = vrot.slane %v764_v29, 4 }
 0x5d3   :  { %v766_v32 = vadd.f32 %v765_v31, %v764_v29  ;;  %v773_v33 = vrot.slane %v772_v30, 4 }
 0x5d5   :  { %v767_v34 = vrot.slane %v766_v32, 2  ;;  %v774_v35 = vadd.f32 %v773_v33, %v772_v30 }
 0x5d7   :  { %v768_v36 = vadd.f32 %v767_v34, %v766_v32  ;;  %v775_v37 = vrot.slane %v774_v35, 2 }
 0x5d9   :  { %v769_v38 = vrot.slane %v768_v36, 1  ;;  %v776_v39 = vadd.f32 %v775_v37, %v774_v35 }
 0x5db   :  { %v770_v41 = vadd.f32 %v769_v38, %v768_v36  ;;  %v777_v42 = vrot.slane %v776_v39, 1 }
 0x5dd   :  { %v771_v43 = vmul.f32 0.125, %v770_v41  ;;  %v778_v44 = vadd.f32 %v777_v42, %v776_v39 }
 0x5df   :  { %v779_v45 = vmul.f32 0.125, %v778_v44  ;;  %v780_v1 = vmul.f32 %v771_v43, %v771_v43  ;;  %v783_v47 = vsub.f32 %v764_v29, %v771_v43 }
 0x5e1   :  { %v781_v2 = vsub.f32 %v779_v45, %v780_v1 }
 0x5e3   :  { %v782_v46 = vmax.f32 %v781_v2, 0.0 }
 0x5e5   :  { %v784_v40 = vadd.f32 1e-05, %v782_v46 }
 0x5e7   :  { %1293 = vrsqrt.f32 %v784_v40 }
 0x5f4   :  { %v1294_v48 = vpop.eup %1293 }
 0x5f5   :  { %v786_v49 = vmul.f32 %v1294_v48, %v783_v47 }
 0x5f7   :  { %v787_v50 = vmax.f32 %v786_v49, 0.0 }
 0x5f9   :  { %1269 = vmatmul.mubr.f32.vlgmr.msra.gmra.mxu0 %v787_v50 }
 0x6b9   :  { %v879_v52 = vpop.f32.mrf.mxu0 }
 0x6ba   :  { %v880_v53 = vadd.f32 %v906_v51, %v879_v52 }
 0x6bb   :  { %v1270_v54 = vpop.f32.mrf.mxu0 }
 0x6bc   :  { %883 = vst [vmem:[#allocation8] sm:$0xff] %v880_v53 }
 0x6bd   :  { %1366 = shalt.err (!%p1363_p5)
}
 0x6be   :  { %893 = dma.vmem_to_hbm [thread:$0]  %s891_s2, 128, %s1564_s3, [#allocation4]  }
 0x6bf   :  { %1379 = dma.done.wait [#allocation4], 128  }
 0x6c0   :  { %1380 = vsyncadd [#allocation4], 4294967168 }
 0x6c1   :  { %897 = vsyncpa [#allocation3], 1 }
 0x6c2   :  { %898 = vsyncpa [#allocation6], 1 }
 0x6c3   :  { %899 = vsyncpa [#allocation4], 1 }

</bundles_post_ra>
